<compile_context>
chip_gen: v6e
topology: v6e:2x2x1
jax: 0.10.0
libtpu: 0.0.40
codegen_flags: <defaults>
</compile_context>

<pallas_src>
import functools
import math

import jax
import jax.numpy as jnp
from jax.experimental import pallas as pl
from jax.experimental.pallas import tpu as pltpu

_LANE = 128          # lane width / output padding granularity
_TK = 1024           # K tile when K is large
_TK_MAX = 2048       # K values up to this stay untiled (single K block)
_BM_MAX = 256        # max batch-block rows
_VMEM_BUDGET = 24 * 1024 * 1024   # tile-selection budget (fits every gen)
_VMEM_LIMIT = 48 * 1024 * 1024    # scoped VMEM limit passed to Mosaic


def _round_up(a, b):
    return (a + b - 1) // b * b


def bilinear_matrix(in_size, out_size):
    """Row-stochastic (out_size, in_size) matrix matching PyTorch
    nn.Upsample(mode='bilinear', align_corners=False)."""
    scale = in_size / out_size
    o = jnp.arange(out_size, dtype=jnp.float32)
    src = (o + 0.5) * scale - 0.5
    src = jnp.maximum(src, 0.0)                       # PyTorch clamps negatives to 0
    i0 = jnp.clip(jnp.floor(src), 0, in_size - 1).astype(jnp.int32)
    i1 = jnp.minimum(i0 + 1, in_size - 1)
    frac = src - i0.astype(jnp.float32)
    rows = jnp.arange(out_size)
    m = jnp.zeros((out_size, in_size), jnp.float32)
    m = m.at[rows, i0].add(1.0 - frac)
    m = m.at[rows, i1].add(frac)
    return m


def build_spp_q_operator(conv_w, bn_gamma, bn_beta, bn_mean, bn_var,
                         *, h, w, down_scale, eps=1e-5):
    """One-time (per weight set) construction of the fused linear operator.

    Returns:
      M    : (K_pad, P_pad) bfloat16 fused resize+conv+BN-scale operator
      bias : (1, P_pad) float32 folded BN bias (padded lanes are 0)
      meta : (c_out, hd, wd, P) Python ints for the forward wrapper
    """
    c_out, c_in, ks, _ = conv_w.shape
    p = ks // 2
    hd = int(math.floor(h * down_scale))
    wd = int(math.floor(w * down_scale))
    K = c_in * h * w
    P = c_out * hd * wd
    P_pad = _round_up(P, _LANE)
    K_pad = K if K <= _TK_MAX else _round_up(K, _TK)

    # Resize matrices with zero border rows/cols (= conv zero padding).
    wh = bilinear_matrix(h, hd)
    ww = bilinear_matrix(w, wd)
    whp = jnp.zeros((hd + 2 * p, h), jnp.float32).at[p:p + hd].set(wh)
    wwp = jnp.zeros((wd + 2 * p, w), jnp.float32).at[p:p + wd].set(ww)
    # Shifted views used by each conv tap: A[dh, oh, h] = whp[oh+dh, h].
    A = jnp.stack([whp[dh:dh + hd] for dh in range(ks)])      # (ks, hd, H)
    B = jnp.stack([wwp[dw:dw + wd] for dw in range(ks)])      # (ks, wd, W)

    # Fold BatchNorm scale into the conv weights; bias stays separate (f32).
    inv = bn_gamma / jnp.sqrt(bn_var + eps)
    w_scaled = conv_w * inv[:, None, None, None]               # (c_out,c_in,ks,ks)
    bias = jnp.broadcast_to((bn_beta - bn_mean * inv)[:, None, None],
                            (c_out, hd, wd)).reshape(1, P)

    # Full fused linear operator: (c_in,H,W) -> (c_out,hd,wd), flattened.
    # M[(ci,h,w),(co,oh,ow)] = sum_{dh,dw} w_scaled[co,ci,dh,dw]
    #                                      * whp[oh+dh,h] * wwp[ow+dw,w]
    M = jnp.einsum('oiyz,yah,zbw->ihwoab', w_scaled, A, B,
                   precision=jax.lax.Precision.HIGHEST).reshape(K, P)

    # Zero-pad K rows (for K tiling) and P columns (lane-dense output).
    if (K_pad != K) or (P_pad != P):
        M = jnp.pad(M, ((0, K_pad - K), (0, P_pad - P)))
        bias = jnp.pad(bias, ((0, 0), (0, P_pad - P)))

    return M.astype(jnp.bfloat16), bias.astype(jnp.float32), (c_out, hd, wd, P)


def _spp_q_kernel(x_ref, m_ref, b_ref, o_ref, acc_ref):
    """One (P-block j, batch-block i, K-block k) tile per grid step.

    x_ref : (bm, tk)  bf16 flattened input block
    m_ref : (tk, bp)  bf16 slice of the fused linear operator
    b_ref : (1, bp)   f32 folded BN bias (broadcast over batch rows)
    o_ref : (bm, bp)  f32 lane-dense output block
    acc_ref: (bm, bp) f32 accumulator scratch (persists across the K sweep)
    """
    @pl.when(pl.program_id(2) == 0)
    def _():
        acc_ref[...] = jnp.zeros_like(acc_ref)

    acc_ref[...] += jnp.dot(x_ref[...], m_ref[...],
                            preferred_element_type=jnp.float32)

    @pl.when(pl.program_id(2) == pl.num_programs(2) - 1)
    def _():
        o_ref[...] = jnp.maximum(acc_ref[...] + b_ref[...], 0.0).astype(o_ref.dtype)


def spp_q_apply(x, M, bias, *, c_out, hd, wd, p_valid):
    """Forward pass given a prebuilt operator.  Safe to wrap in jax.jit."""
    n, c_in, h, w = x.shape
    K = c_in * h * w
    K_pad, P_pad = M.shape
    tk = K_pad if K_pad <= _TK_MAX else _TK
    nk = K_pad // tk

    # Batch block: multiple of 16 (bf16 sublane packing), up to _BM_MAX rows.
    if _round_up(n, 16) <= _BM_MAX:
        bm = _round_up(n, 16)
        n_pad = bm
    else:
        bm = _BM_MAX
        n_pad = _round_up(n, bm)
    nb = n_pad // bm

    # Output block: largest lane-dense divisor of P_pad within the VMEM budget.
    def _vmem_est(bp_):
        return (2 * tk * bp_ * 2        # M tile, bf16, double-buffered
                + 2 * bm * tk * 2       # x tile, bf16, double-buffered
                + 3 * bm * bp_ * 4      # out (x2) + accumulator, f32
                + 2 * bp_ * 4)          # bias, f32, double-buffered
    bp = _LANE
    cand = P_pad
    while cand >= _LANE:
        if (cand % _LANE == 0 and P_pad % cand == 0 and cand <= 1024
                and _vmem_est(cand) <= _VMEM_BUDGET):
            bp = cand
            break
        cand -= _LANE
    np_blocks = P_pad // bp

    x_flat = x.reshape(n, K).astype(jnp.bfloat16)
    if (n_pad != n) or (K_pad != K):
        x_flat = jnp.pad(x_flat, ((0, n_pad - n), (0, K_pad - K)))

    out_flat = pl.pallas_call(
        _spp_q_kernel,
        out_shape=jax.ShapeDtypeStruct((n_pad, P_pad), jnp.float32),
        grid_spec=pltpu.PrefetchScalarGridSpec(
            num_scalar_prefetch=0,
            # P blocks outermost, batch blocks middle, K innermost: when nk==1
            # the large M tile's block index is constant across the inner batch
            # sweep (streamed once per P block); K is the reduction axis.
            grid=(np_blocks, nb, nk),
            in_specs=[
                pl.BlockSpec((bm, tk), lambda j, i, k: (i, k)),
                pl.BlockSpec((tk, bp), lambda j, i, k: (k, j)),
                pl.BlockSpec((1, bp), lambda j, i, k: (0, j)),
            ],
            out_specs=pl.BlockSpec((bm, bp), lambda j, i, k: (i, j)),
            scratch_shapes=[pltpu.VMEM((bm, bp), jnp.float32)],
        ),
        compiler_params=pltpu.CompilerParams(
            dimension_semantics=("parallel", "parallel", "arbitrary"),
            vmem_limit_bytes=_VMEM_LIMIT,
        ),
    )(x_flat, M, bias)

    return out_flat[:n, :p_valid].reshape(n, c_out, hd, wd)


def spp_q_reference(x, conv_w, bn_gamma, bn_beta, bn_mean, bn_var,
                    down_scale, eps=1e-5):
    """Pure-JAX reference (same semantics) for sanity checking."""
    n, c_in, h, w = x.shape
    hd = int(math.floor(h * down_scale))
    wd = int(math.floor(w * down_scale))
    wh = bilinear_matrix(h, hd)
    ww = bilinear_matrix(w, wd)
    xd = jnp.einsum('oh,nchw->ncow', wh, x, precision=jax.lax.Precision.HIGHEST)
    xd = jnp.einsum('ncow,qw->ncoq', xd, ww, precision=jax.lax.Precision.HIGHEST)
    y = jax.lax.conv_general_dilated(
        xd, conv_w, window_strides=(1, 1), padding='SAME',
        dimension_numbers=('NCHW', 'OIHW', 'NCHW'),
        precision=jax.lax.Precision.HIGHEST)
    inv = bn_gamma / jnp.sqrt(bn_var + eps)
    y = y * inv[None, :, None, None] + (bn_beta - bn_mean * inv)[None, :, None, None]
    return jnp.maximum(y, 0.0)


if __name__ == "__main__":
    key = jax.random.PRNGKey(0)
    k_x, k_w = jax.random.split(key)

    N, C_in, H, W = 2, 4, 16, 16
    C_out, ks, down_scale = 8, 3, 0.5

    x = jax.random.normal(k_x, (N, C_in, H, W), jnp.float32)
    conv_w = 0.1 * jax.random.normal(k_w, (C_out, C_in, ks, ks), jnp.float32)
    bn_gamma = 1.0 + 0.1 * jnp.arange(C_out, dtype=jnp.float32)
    bn_beta = 0.05 * jnp.arange(C_out, dtype=jnp.float32)
    bn_mean = 0.02 * jnp.arange(C_out, dtype=jnp.float32)
    bn_var = 1.0 + 0.03 * jnp.arange(C_out, dtype=jnp.float32)

    # Hoisted operator construction: built ONCE per weight set, outside the
    # jitted forward (perf feedback: don't re-emit the einsum per call).
    M, bias, (c_out, hd, wd, P) = build_spp_q_operator(
        conv_w, bn_gamma, bn_beta, bn_mean, bn_var,
        h=H, w=W, down_scale=down_scale)
    M, bias = jax.block_until_ready((M, bias))

    fwd = jax.jit(functools.partial(spp_q_apply, c_out=c_out, hd=hd,
                                    wd=wd, p_valid=P))
    out = jax.block_until_ready(fwd(x, M, bias))

    assert out.shape == (N, C_out, H // 2, W // 2), out.shape

    ref = spp_q_reference(x, conv_w, bn_gamma, bn_beta, bn_mean, bn_var, down_scale)
    # bf16 operands with f32 accumulation vs. HIGHEST-precision f32 reference.
    err = float(jnp.abs(out - ref).max())
    assert jnp.allclose(out, ref, atol=2e-2, rtol=2e-2), err

    print("KERNEL_OK")
</pallas_src>

<mosaic_0001>
module attributes {stable_mosaic.version = 11 : i64} {
  func.func @_spp_q_kernel(%arg0: i32, %arg1: i32, %arg2: i32, %arg3: memref<16x1024xbf16, #tpu.memory_space<vmem>>, %arg4: memref<1024x512xbf16, #tpu.memory_space<vmem>>, %arg5: memref<1x512xf32, #tpu.memory_space<vmem>>, %arg6: memref<16x512xf32, #tpu.memory_space<vmem>>, %arg7: memref<16x512xf32, #tpu.memory_space<vmem>>) attributes {dimension_semantics = [#tpu.dimension_semantics<parallel>, #tpu.dimension_semantics<parallel>, #tpu.dimension_semantics<arbitrary>], iteration_bounds = array<i64: 1, 1, 1>, scalar_prefetch = 0 : i64, scratch_operands = 1 : i64, tpu.core_type = #tpu.core_type<tc>, window_params = [{transform_indices = @transform_0, window_bounds = array<i64: 16, 1024>}, {transform_indices = @transform_1, window_bounds = array<i64: 1024, 512>}, {transform_indices = @transform_2, window_bounds = array<i64: 1, 512>}, {transform_indices = @transform_3, window_bounds = array<i64: 16, 512>}]} {
    %c0_i32 = arith.constant 0 : i32
    %0 = arith.cmpi eq, %arg2, %c0_i32 : i32
    %1 = arith.extui %0 : i1 to i32
    %c0_i32_0 = arith.constant 0 : i32
    %2 = arith.cmpi ne, %1, %c0_i32_0 : i32
    scf.if %2 {
      %cst_10 = arith.constant 0.000000e+00 : f32
      %12 = vector.broadcast %cst_10 : f32 to vector<16x512xf32>
      %c0_11 = arith.constant 0 : index
      %c0_12 = arith.constant 0 : index
      %13 = vector.load %arg7[%c0_11, %c0_12] : memref<16x512xf32, #tpu.memory_space<vmem>>, vector<16x512xf32>
      tpu.vector_store %arg7[%c0_11, %c0_12], %12 {strides = array<i32>} : memref<16x512xf32, #tpu.memory_space<vmem>>, vector<16x512xf32>,
    } else {
    }
    %c0 = arith.constant 0 : index
    %c0_1 = arith.constant 0 : index
    %3 = vector.load %arg7[%c0, %c0_1] : memref<16x512xf32, #tpu.memory_space<vmem>>, vector<16x512xf32>
    %c0_2 = arith.constant 0 : index
    %c0_3 = arith.constant 0 : index
    %4 = vector.load %arg3[%c0_2, %c0_3] : memref<16x1024xbf16, #tpu.memory_space<vmem>>, vector<16x1024xbf16>
    %c0_4 = arith.constant 0 : index
    %c0_5 = arith.constant 0 : index
    %5 = vector.load %arg4[%c0_4, %c0_5] : memref<1024x512xbf16, #tpu.memory_space<vmem>>, vector<1024x512xbf16>
    %cst = arith.constant dense<0.000000e+00> : vector<16x512xf32>
    %6 = tpu.matmul %4, %5, %cst {dimension_numbers = #tpu.dot_dimension_numbers<[1], [0], [0], [1], [0, 0, 1, 1], [], []>} : vector<16x1024xbf16>, vector<1024x512xbf16>, vector<16x512xf32> -> vector<16x512xf32>
    %7 = arith.addf %3, %6 : vector<16x512xf32>
    %c0_6 = arith.constant 0 : index
    %c0_7 = arith.constant 0 : index
    %8 = vector.load %arg7[%c0_6, %c0_7] : memref<16x512xf32, #tpu.memory_space<vmem>>, vector<16x512xf32>
    tpu.vector_store %arg7[%c0_6, %c0_7], %7 {strides = array<i32>} : memref<16x512xf32, #tpu.memory_space<vmem>>, vector<16x512xf32>,
    %c0_i32_8 = arith.constant 0 : i32
    %9 = arith.cmpi eq, %arg2, %c0_i32_8 : i32
    %10 = arith.extui %9 : i1 to i32
    %c0_i32_9 = arith.constant 0 : i32
    %11 = arith.cmpi ne, %10, %c0_i32_9 : i32
    scf.if %11 {
      %c0_10 = arith.constant 0 : index
      %c0_11 = arith.constant 0 : index
      %12 = vector.load %arg7[%c0_10, %c0_11] : memref<16x512xf32, #tpu.memory_space<vmem>>, vector<16x512xf32>
      %c0_12 = arith.constant 0 : index
      %c0_13 = arith.constant 0 : index
      %13 = vector.load %arg5[%c0_12, %c0_13] : memref<1x512xf32, #tpu.memory_space<vmem>>, vector<1x512xf32>
      %14 = vector.broadcast %13 : vector<1x512xf32> to vector<16x512xf32>
      %15 = arith.addf %12, %14 : vector<16x512xf32>
      %cst_14 = arith.constant 0.000000e+00 : f32
      %16 = vector.broadcast %cst_14 : f32 to vector<16x512xf32>
      %17 = arith.maximumf %15, %16 : vector<16x512xf32>
      %c0_15 = arith.constant 0 : index
      %c0_16 = arith.constant 0 : index
      %18 = vector.load %arg6[%c0_15, %c0_16] : memref<16x512xf32, #tpu.memory_space<vmem>>, vector<16x512xf32>
      tpu.vector_store %arg6[%c0_15, %c0_16], %17 {strides = array<i32>} : memref<16x512xf32, #tpu.memory_space<vmem>>, vector<16x512xf32>,
    } else {
    }
    return
  }
  func.func @transform_0(%arg0: i32, %arg1: i32, %arg2: i32) -> (i32, i32) {
    %c0_i32 = arith.constant 0 : i32
    return %arg1, %arg2 : i32, i32
  }
  func.func @transform_1(%arg0: i32, %arg1: i32, %arg2: i32) -> (i32, i32) {
    %c0_i32 = arith.constant 0 : i32
    return %arg2, %arg0 : i32, i32
  }
  func.func @transform_2(%arg0: i32, %arg1: i32, %arg2: i32) -> (i32, i32) {
    %c0_i32 = arith.constant 0 : i32
    %c0_i32_0 = arith.constant 0 : i32
    return %c0_i32, %arg0 : i32, i32
  }
  func.func @transform_3(%arg0: i32, %arg1: i32, %arg2: i32) -> (i32, i32) {
    %c0_i32 = arith.constant 0 : i32
    return %arg1, %arg0 : i32, i32
  }
}

</mosaic_0001>

<bundles_post_ra>
// kernel: spp_q_apply.1
= control target key start
LH: loop header
LB: loop body
LE: loop exit
PB: predicated region body
PF: predicated region fallthrough
CT: control target
= control target key end

     0   :  { %8 = vsyncpa [#allocation4], 0  ;;  %s2727_s12 = smov [#allocation3]   ;;  %s2858_s0 = inlined_call_operand.vmem [shape: bf16[16,1024], index: 0, kind: input, shape index: {}]   ;;  %s2859_s1 = inlined_call_operand.hbm [shape: bf16[1024,512], index: 1, kind: input, shape index: {}]   ;;  %s2860_s2 = inlined_call_operand.vmem [shape: f32[1,512], index: 2, kind: input, shape index: {}]   ;;  %s2861_s3 = inlined_call_operand.vmem [shape: f32[16,512], index: 3, kind: output, shape index: {}]  }
   0x1   :  { %s16_s13 = sshll.u32 %s2727_s12, 4  ;;  %s17_s13 = int_to_ptr.vmem [resolvable:$true] %s16_s13 }
   0x2   :  { %s2713_s14 = scalar_lea.vmem %s17_s13, 32768  ;;  %p2718_p1 = scmp.lt.s32.totalorder %s17_s13, %s17_s13 }
   0x3   :  { %p2714_p0 = scmp.ne.s32.totalorder %s17_s13, %s2713_s14  ;;  %p2719_p2 = scmp.lt.s32.totalorder %s2713_s14, %s2713_s14 }
   0x5   :  { %p2720_p3 = por %p2719_p2, %p2718_p1 }
   0x7   :  { %p2721_p4 = pnand %p2720_p3, %p2714_p0 }
   0x9   :  { %2724 = shalt.err (!%p2721_p4)
}
   0xa   :  { %s2728_s15 = smov 256   ;;  %s2729_s16 = smov 16  }
   0xb   :  { %22 = dma.hbm_to_vmem [thread:$0]  %s2859_s1, 32768, %s17_s13, [#allocation4], %s2728_s15, %s2728_s15, %s2729_s16  }
   0xc   :  { %2725 = dma.done.wait [#allocation4], 32768  }
   0xd   :  { %2726 = vsyncadd [#allocation4], 4294934528  ;;  %v2321_v0 = vld [vmem:[#allocation3 + $0xe4] ss:$16 sps:$4 sm:$0xff]   ;;  %v2325_v2 = vld [vmem:[#allocation3 + $0xe0] ss:$16 sps:$4 sm:$0xff]  }
   0xe   :  { %v2323_v1 = vld [vmem:[#allocation3 + $0x2e4] ss:$16 sps:$4 sm:$0xff]   ;;  %1632 = vmatprep.subr.bf16.mxu0 %v2321_v0  ;;  %v2326_v3 = vld [vmem:[#allocation3 + $0x2e0] ss:$16 sps:$4 sm:$0xff]   ;;  %v49_v50 = vld [vmem:[%s2858_s0 + $0x8] sm:$0xff] }
   0xf   :  { %1675 = vmatprep.subr.bf16.mxu1 %v2323_v1  ;;  %v2327_v4 = vld [vmem:[#allocation3 + $0xc4] ss:$16 sps:$4 sm:$0xff]   ;;  %1633 = vmatpush1.bf16.msra.mxu0 %v2325_v2  ;;  %v2331_v6 = vld [vmem:[#allocation3 + $0xc0] ss:$16 sps:$4 sm:$0xff]   ;;  %v53_v51 = vld [vmem:[%s2858_s0 + $0x28] sm:$0xff] }
  0x10   :  { %1676 = vmatpush1.bf16.msra.mxu1 %v2326_v3  ;;  %v2329_v5 = vld [vmem:[#allocation3 + $0x2c4] ss:$16 sps:$4 sm:$0xff]   ;;  %1634 = vmatprep.subr.bf16.mxu0 %v2327_v4  ;;  %v2332_v7 = vld [vmem:[#allocation3 + $0x2c0] ss:$16 sps:$4 sm:$0xff]   ;;  %v2767_v55 = vcombine.high %v49_v50, %v53_v51 }
  0x11   :  { %1677 = vmatprep.subr.bf16.mxu1 %v2329_v5  ;;  %v2333_v8 = vld [vmem:[#allocation3 + $0xa4] ss:$16 sps:$4 sm:$0xff]   ;;  %v2337_v10 = vld [vmem:[#allocation3 + $0xa0] ss:$16 sps:$4 sm:$0xff]  }
  0x12   :  { %v2335_v9 = vld [vmem:[#allocation3 + $0x2a4] ss:$16 sps:$4 sm:$0xff]   ;;  %v2338_v11 = vld [vmem:[#allocation3 + $0x2a0] ss:$16 sps:$4 sm:$0xff]   ;;  %1707 = vmatprep.mubr.bf16.mxu1 %v2767_v55 }
  0x13   :  { %1635 = vmatpush1.bf16.msra.mxu0 %v2331_v6  ;;  %v2339_v12 = vld [vmem:[#allocation3 + $0x84] ss:$16 sps:$4 sm:$0xff]   ;;  %v2343_v14 = vld [vmem:[#allocation3 + $0x80] ss:$16 sps:$4 sm:$0xff]  }
  0x14   :  { %1678 = vmatpush1.bf16.msra.mxu1 %v2332_v7  ;;  %1636 = vmatprep.subr.bf16.mxu0 %v2333_v8  ;;  %v2341_v13 = vld [vmem:[#allocation3 + $0x284] ss:$16 sps:$4 sm:$0xff]   ;;  %v2344_v15 = vld [vmem:[#allocation3 + $0x280] ss:$16 sps:$4 sm:$0xff]  }
  0x15   :  { %1679 = vmatprep.subr.bf16.mxu1 %v2335_v9  ;;  %v2345_v16 = vld [vmem:[#allocation3 + $0x64] ss:$16 sps:$4 sm:$0xff]   ;;  %v2349_v18 = vld [vmem:[#allocation3 + $0x60] ss:$16 sps:$4 sm:$0xff]   ;;  %v2773_v9 = vcombine.low %v49_v50, %v53_v51 }
  0x16   :  { %v2347_v17 = vld [vmem:[#allocation3 + $0x264] ss:$16 sps:$4 sm:$0xff]   ;;  %v2350_v19 = vld [vmem:[#allocation3 + $0x260] ss:$16 sps:$4 sm:$0xff]  }
  0x17   :  { %1637 = vmatpush1.bf16.msra.mxu0 %v2337_v10  ;;  %v2351_v20 = vld [vmem:[#allocation3 + $0x44] ss:$16 sps:$4 sm:$0xff]   ;;  %v2355_v22 = vld [vmem:[#allocation3 + $0x40] ss:$16 sps:$4 sm:$0xff]  }
  0x18   :  { %1680 = vmatpush1.bf16.msra.mxu1 %v2338_v11  ;;  %1638 = vmatprep.subr.bf16.mxu0 %v2339_v12  ;;  %v2353_v21 = vld [vmem:[#allocation3 + $0x244] ss:$16 sps:$4 sm:$0xff]   ;;  %v2356_v23 = vld [vmem:[#allocation3 + $0x240] ss:$16 sps:$4 sm:$0xff]  }
  0x19   :  { %1681 = vmatprep.subr.bf16.mxu1 %v2341_v13  ;;  %v2357_v24 = vld [vmem:[#allocation3 + $0x24] ss:$16 sps:$4 sm:$0xff]   ;;  %v2361_v26 = vld [vmem:[#allocation3 + $0x20] ss:$16 sps:$4 sm:$0xff]  }
  0x1a   :  { %v2359_v25 = vld [vmem:[#allocation3 + $0x224] ss:$16 sps:$4 sm:$0xff]   ;;  %v2362_v27 = vld [vmem:[#allocation3 + $0x220] ss:$16 sps:$4 sm:$0xff]  }
  0x1b   :  { %1639 = vmatpush1.bf16.msra.mxu0 %v2343_v14  ;;  %v2363_v28 = vld [vmem:[#allocation3 + $0x4] ss:$16 sps:$4 sm:$0xff]   ;;  %v2367_v30 = vld [vmem:[#allocation3] ss:$16 sps:$4 sm:$0xff]  }
  0x1c   :  { %1682 = vmatpush1.bf16.msra.mxu1 %v2344_v15  ;;  %1640 = vmatprep.subr.bf16.mxu0 %v2345_v16  ;;  %v2365_v29 = vld [vmem:[#allocation3 + $0x204] ss:$16 sps:$4 sm:$0xff]   ;;  %v2368_v31 = vld [vmem:[#allocation3 + $0x200] ss:$16 sps:$4 sm:$0xff]  }
  0x1d   :  { %1683 = vmatprep.subr.bf16.mxu1 %v2347_v17  ;;  %v2369_v32 = vld [vmem:[#allocation3 + $0x1e4] ss:$16 sps:$4 sm:$0xff]   ;;  %v2373_v34 = vld [vmem:[#allocation3 + $0x1e0] ss:$16 sps:$4 sm:$0xff]  }
  0x1e   :  { %v2371_v33 = vld [vmem:[#allocation3 + $0x3e4] ss:$16 sps:$4 sm:$0xff]   ;;  %v2374_v35 = vld [vmem:[#allocation3 + $0x3e0] ss:$16 sps:$4 sm:$0xff]  }
  0x1f   :  { %1641 = vmatpush1.bf16.msra.mxu0 %v2349_v18  ;;  %v2375_v36 = vld [vmem:[#allocation3 + $0x1c4] ss:$16 sps:$4 sm:$0xff]   ;;  %v2379_v38 = vld [vmem:[#allocation3 + $0x1c0] ss:$16 sps:$4 sm:$0xff]  }
  0x20   :  { %1684 = vmatpush1.bf16.msra.mxu1 %v2350_v19  ;;  %1642 = vmatprep.subr.bf16.mxu0 %v2351_v20  ;;  %v2377_v37 = vld [vmem:[#allocation3 + $0x3c4] ss:$16 sps:$4 sm:$0xff]   ;;  %v2380_v39 = vld [vmem:[#allocation3 + $0x3c0] ss:$16 sps:$4 sm:$0xff]  }
  0x21   :  { %1685 = vmatprep.subr.bf16.mxu1 %v2353_v21  ;;  %v2381_v40 = vld [vmem:[#allocation3 + $0x1a4] ss:$16 sps:$4 sm:$0xff]   ;;  %v2385_v42 = vld [vmem:[#allocation3 + $0x1a0] ss:$16 sps:$4 sm:$0xff]  }
  0x22   :  { %v2383_v41 = vld [vmem:[#allocation3 + $0x3a4] ss:$16 sps:$4 sm:$0xff]   ;;  %v2386_v43 = vld [vmem:[#allocation3 + $0x3a0] ss:$16 sps:$4 sm:$0xff]  }
  0x23   :  { %1643 = vmatpush1.bf16.msra.mxu0 %v2355_v22  ;;  %v2387_v44 = vld [vmem:[#allocation3 + $0x184] ss:$16 sps:$4 sm:$0xff]   ;;  %v2391_v46 = vld [vmem:[#allocation3 + $0x180] ss:$16 sps:$4 sm:$0xff]  }
  0x24   :  { %1686 = vmatpush1.bf16.msra.mxu1 %v2356_v23  ;;  %1644 = vmatprep.subr.bf16.mxu0 %v2357_v24  ;;  %v2389_v45 = vld [vmem:[#allocation3 + $0x384] ss:$16 sps:$4 sm:$0xff]   ;;  %v2392_v47 = vld [vmem:[#allocation3 + $0x380] ss:$16 sps:$4 sm:$0xff]  }
  0x25   :  { %1687 = vmatprep.subr.bf16.mxu1 %v2359_v25  ;;  %v48_v48 = vld [vmem:[%s2858_s0] sm:$0xff] }
  0x26   :  { %v52_v49 = vld [vmem:[%s2858_s0 + $0x20] sm:$0xff] }
  0x27   :  { %1645 = vmatpush1.bf16.msra.mxu0 %v2361_v26  ;;  %v2393_v52 = vld [vmem:[#allocation3 + $0x164] ss:$16 sps:$4 sm:$0xff]   ;;  %v2765_v53 = vcombine.high %v48_v48, %v52_v49  ;;  %v2397_v56 = vld [vmem:[#allocation3 + $0x160] ss:$16 sps:$4 sm:$0xff]   ;;  %v2771_v8 = vcombine.low %v48_v48, %v52_v49 }
  0x28   :  { %1688 = vmatpush1.bf16.msra.mxu1 %v2362_v27  ;;  %1646 = vmatprep.subr.bf16.mxu0 %v2363_v28  ;;  %v2395_v54 = vld [vmem:[#allocation3 + $0x364] ss:$16 sps:$4 sm:$0xff]   ;;  %v2398_v57 = vld [vmem:[#allocation3 + $0x360] ss:$16 sps:$4 sm:$0xff]  }
  0x29   :  { %1689 = vmatprep.subr.bf16.mxu1 %v2365_v29  ;;  %1664 = vmatprep.mubr.bf16.mxu0 %v2765_v53  ;;  %v2399_v58 = vld [vmem:[#allocation3 + $0x144] ss:$16 sps:$4 sm:$0xff]   ;;  %v2403_v60 = vld [vmem:[#allocation3 + $0x140] ss:$16 sps:$4 sm:$0xff]  }
  0x2a   :  { %v2401_v59 = vld [vmem:[#allocation3 + $0x344] ss:$16 sps:$4 sm:$0xff]   ;;  %v2404_v61 = vld [vmem:[#allocation3 + $0x340] ss:$16 sps:$4 sm:$0xff]  }
  0x2b   :  { %1647 = vmatpush1.bf16.msra.mxu0 %v2367_v30  ;;  %v2405_v62 = vld [vmem:[#allocation3 + $0x124] ss:$16 sps:$4 sm:$0xff]   ;;  %v2409_v0 = vld [vmem:[#allocation3 + $0x120] ss:$16 sps:$4 sm:$0xff]  }
  0x2c   :  { %1690 = vmatpush1.bf16.msra.mxu1 %v2368_v31  ;;  %1648 = vmatprep.subr.bf16.mxu0 %v2369_v32  ;;  %v2407_v63 = vld [vmem:[#allocation3 + $0x324] ss:$16 sps:$4 sm:$0xff]   ;;  %v2410_v1 = vld [vmem:[#allocation3 + $0x320] ss:$16 sps:$4 sm:$0xff]  }
  0x2d   :  { %1691 = vmatprep.subr.bf16.mxu1 %v2371_v33  ;;  %v2411_v2 = vld [vmem:[#allocation3 + $0x104] ss:$16 sps:$4 sm:$0xff]   ;;  %v2415_v4 = vld [vmem:[#allocation3 + $0x100] ss:$16 sps:$4 sm:$0xff]  }
  0x2e   :  { %v2413_v3 = vld [vmem:[#allocation3 + $0x304] ss:$16 sps:$4 sm:$0xff]   ;;  %v2416_v5 = vld [vmem:[#allocation3 + $0x300] ss:$16 sps:$4 sm:$0xff]  }
  0x2f   :  { %1649 = vmatpush2.bf16.msra.mxu0 %v2373_v34  ;;  %v2419_v6 = vld [vmem:[#allocation3 + $0x4e4] ss:$16 sps:$4 sm:$0xff]   ;;  %v2417_v10 = vld [vmem:[#allocation3 + $0x4e0] ss:$16 sps:$4 sm:$0xff]  }
  0x30   :  { %1692 = vmatpush2.bf16.msra.mxu1 %v2374_v35  ;;  %1650 = vmatprep.subr.bf16.mxu0 %v2375_v36  ;;  %v2422_v7 = vld [vmem:[#allocation3 + $0x6e4] ss:$16 sps:$4 sm:$0xff]   ;;  %v2420_v11 = vld [vmem:[#allocation3 + $0x6e0] ss:$16 sps:$4 sm:$0xff]  }
  0x31   :  { %1693 = vmatprep.subr.bf16.mxu1 %v2377_v37  ;;  %v2425_v12 = vld [vmem:[#allocation3 + $0x4c4] ss:$16 sps:$4 sm:$0xff]   ;;  %v2423_v14 = vld [vmem:[#allocation3 + $0x4c0] ss:$16 sps:$4 sm:$0xff]  }
  0x32   :  { %v2428_v13 = vld [vmem:[#allocation3 + $0x6c4] ss:$16 sps:$4 sm:$0xff]   ;;  %v2426_v15 = vld [vmem:[#allocation3 + $0x6c0] ss:$16 sps:$4 sm:$0xff]  }
  0x33   :  { %1651 = vmatpush2.bf16.msra.mxu0 %v2379_v38  ;;  %v2431_v16 = vld [vmem:[#allocation3 + $0x4a4] ss:$16 sps:$4 sm:$0xff]   ;;  %v2429_v18 = vld [vmem:[#allocation3 + $0x4a0] ss:$16 sps:$4 sm:$0xff]   ;;  %v2790_v38 = vld [vmem:[%s2858_s0 + $0x18] sm:$0xff] }
  0x34   :  { %1694 = vmatpush2.bf16.msra.mxu1 %v2380_v39  ;;  %1652 = vmatprep.subr.bf16.mxu0 %v2381_v40  ;;  %v2434_v17 = vld [vmem:[#allocation3 + $0x6a4] ss:$16 sps:$4 sm:$0xff]   ;;  %v2432_v19 = vld [vmem:[#allocation3 + $0x6a0] ss:$16 sps:$4 sm:$0xff]   ;;  %v2795_v39 = vld [vmem:[%s2858_s0 + $0x38] sm:$0xff] }
  0x35   :  { %1695 = vmatprep.subr.bf16.mxu1 %v2383_v41  ;;  %v2437_v20 = vld [vmem:[#allocation3 + $0x484] ss:$16 sps:$4 sm:$0xff]   ;;  %v2435_v22 = vld [vmem:[#allocation3 + $0x480] ss:$16 sps:$4 sm:$0xff]  }
  0x36   :  { %v2440_v21 = vld [vmem:[#allocation3 + $0x684] ss:$16 sps:$4 sm:$0xff]   ;;  %v2438_v23 = vld [vmem:[#allocation3 + $0x680] ss:$16 sps:$4 sm:$0xff]  }
  0x37   :  { %1653 = vmatpush2.bf16.msra.mxu0 %v2385_v42  ;;  %v2443_v24 = vld [vmem:[#allocation3 + $0x464] ss:$16 sps:$4 sm:$0xff]   ;;  %v2441_v26 = vld [vmem:[#allocation3 + $0x460] ss:$16 sps:$4 sm:$0xff]  }
  0x38   :  { %1696 = vmatpush2.bf16.msra.mxu1 %v2386_v43  ;;  %1654 = vmatprep.subr.bf16.mxu0 %v2387_v44  ;;  %v2446_v25 = vld [vmem:[#allocation3 + $0x664] ss:$16 sps:$4 sm:$0xff]   ;;  %v2444_v27 = vld [vmem:[#allocation3 + $0x660] ss:$16 sps:$4 sm:$0xff]   ;;  %v2803_v43 = vcombine.high %v2790_v38, %v2795_v39 }
  0x39   :  { %1697 = vmatprep.subr.bf16.mxu1 %v2389_v45  ;;  %v2449_v28 = vld [vmem:[#allocation3 + $0x444] ss:$16 sps:$4 sm:$0xff]   ;;  %v2447_v30 = vld [vmem:[#allocation3 + $0x440] ss:$16 sps:$4 sm:$0xff]  }
  0x3a   :  { %v2452_v29 = vld [vmem:[#allocation3 + $0x644] ss:$16 sps:$4 sm:$0xff]   ;;  %v2450_v31 = vld [vmem:[#allocation3 + $0x640] ss:$16 sps:$4 sm:$0xff]  }
  0x3b   :  { %1655 = vmatpush2.bf16.msra.mxu0 %v2391_v46  ;;  %v2455_v32 = vld [vmem:[#allocation3 + $0x424] ss:$16 sps:$4 sm:$0xff]   ;;  %v2453_v34 = vld [vmem:[#allocation3 + $0x420] ss:$16 sps:$4 sm:$0xff]  }
  0x3c   :  { %1698 = vmatpush2.bf16.msra.mxu1 %v2392_v47  ;;  %1656 = vmatprep.subr.bf16.mxu0 %v2393_v52  ;;  %v2458_v33 = vld [vmem:[#allocation3 + $0x624] ss:$16 sps:$4 sm:$0xff]   ;;  %v2456_v35 = vld [vmem:[#allocation3 + $0x620] ss:$16 sps:$4 sm:$0xff]  }
  0x3d   :  { %1699 = vmatprep.subr.bf16.mxu1 %v2395_v54  ;;  %v2780_v36 = vld [vmem:[%s2858_s0 + $0x10] sm:$0xff] }
  0x3e   :  { %v2785_v37 = vld [vmem:[%s2858_s0 + $0x30] sm:$0xff] }
  0x3f   :  { %1657 = vmatpush2.bf16.msra.mxu0 %v2397_v56  ;;  %v2461_v40 = vld [vmem:[#allocation3 + $0x404] ss:$16 sps:$4 sm:$0xff]   ;;  %v2799_v41 = vcombine.high %v2780_v36, %v2785_v37  ;;  %v2459_v44 = vld [vmem:[#allocation3 + $0x400] ss:$16 sps:$4 sm:$0xff]  }
  0x40   :  { %1700 = vmatpush2.bf16.msra.mxu1 %v2398_v57  ;;  %1658 = vmatprep.subr.bf16.mxu0 %v2399_v58  ;;  %v2464_v42 = vld [vmem:[#allocation3 + $0x604] ss:$16 sps:$4 sm:$0xff]   ;;  %v2462_v45 = vld [vmem:[#allocation3 + $0x600] ss:$16 sps:$4 sm:$0xff]  }
  0x41   :  { %1701 = vmatprep.subr.bf16.mxu1 %v2401_v59  ;;  %v2467_v46 = vld [vmem:[#allocation3 + $0x5e4] ss:$16 sps:$4 sm:$0xff]   ;;  %v2465_v48 = vld [vmem:[#allocation3 + $0x5e0] ss:$16 sps:$4 sm:$0xff]  }
  0x42   :  { %v2470_v47 = vld [vmem:[#allocation3 + $0x7e4] ss:$16 sps:$4 sm:$0xff]   ;;  %v2468_v49 = vld [vmem:[#allocation3 + $0x7e0] ss:$16 sps:$4 sm:$0xff]  }
  0x43   :  { %1659 = vmatpush2.bf16.msra.mxu0 %v2403_v60  ;;  %v2473_v50 = vld [vmem:[#allocation3 + $0x5c4] ss:$16 sps:$4 sm:$0xff]   ;;  %v2471_v52 = vld [vmem:[#allocation3 + $0x5c0] ss:$16 sps:$4 sm:$0xff]  }
  0x44   :  { %1702 = vmatpush2.bf16.msra.mxu1 %v2404_v61  ;;  %1660 = vmatprep.subr.bf16.mxu0 %v2405_v62  ;;  %v2476_v51 = vld [vmem:[#allocation3 + $0x7c4] ss:$16 sps:$4 sm:$0xff]   ;;  %v2474_v54 = vld [vmem:[#allocation3 + $0x7c0] ss:$16 sps:$4 sm:$0xff]  }
  0x45   :  { %1703 = vmatprep.subr.bf16.mxu1 %v2407_v63  ;;  %v2479_v56 = vld [vmem:[#allocation3 + $0x5a4] ss:$16 sps:$4 sm:$0xff]   ;;  %v2477_v58 = vld [vmem:[#allocation3 + $0x5a0] ss:$16 sps:$4 sm:$0xff]  }
  0x46   :  { %v2482_v57 = vld [vmem:[#allocation3 + $0x7a4] ss:$16 sps:$4 sm:$0xff]   ;;  %v2480_v59 = vld [vmem:[#allocation3 + $0x7a0] ss:$16 sps:$4 sm:$0xff]  }
  0x47   :  { %1661 = vmatpush2.bf16.msra.mxu0 %v2409_v0  ;;  %v2485_v60 = vld [vmem:[#allocation3 + $0x584] ss:$16 sps:$4 sm:$0xff]   ;;  %v2483_v62 = vld [vmem:[#allocation3 + $0x580] ss:$16 sps:$4 sm:$0xff]  }
  0x48   :  { %1704 = vmatpush2.bf16.msra.mxu1 %v2410_v1  ;;  %1662 = vmatprep.subr.bf16.mxu0 %v2411_v2  ;;  %v2488_v61 = vld [vmem:[#allocation3 + $0x784] ss:$16 sps:$4 sm:$0xff]   ;;  %v2486_v63 = vld [vmem:[#allocation3 + $0x780] ss:$16 sps:$4 sm:$0xff]  }
  0x49   :  { %1705 = vmatprep.subr.bf16.mxu1 %v2413_v3  ;;  %v2491_v0 = vld [vmem:[#allocation3 + $0x564] ss:$16 sps:$4 sm:$0xff]   ;;  %v2489_v2 = vld [vmem:[#allocation3 + $0x560] ss:$16 sps:$4 sm:$0xff]  }
  0x4a   :  { %v2494_v1 = vld [vmem:[#allocation3 + $0x764] ss:$16 sps:$4 sm:$0xff]   ;;  %v2492_v3 = vld [vmem:[#allocation3 + $0x760] ss:$16 sps:$4 sm:$0xff]  }
  0x4b   :  { %1663 = vmatpush2.bf16.msra.mxu0 %v2415_v4  ;;  %v2497_v4 = vld [vmem:[#allocation3 + $0x544] ss:$16 sps:$4 sm:$0xff]  }
  0x4c   :  { %1706 = vmatpush2.bf16.msra.mxu1 %v2416_v5  ;;  %1718 = vmatprep.subr.bf16.mxu0 %v2419_v6  ;;  %v2500_v5 = vld [vmem:[#allocation3 + $0x744] ss:$16 sps:$4 sm:$0xff]   ;;  %v2495_v6 = vld [vmem:[#allocation3 + $0x540] ss:$16 sps:$4 sm:$0xff]  }
  0x4d   :  { %1761 = vmatprep.subr.bf16.mxu1 %v2422_v7  ;;  %v2498_v7 = vld [vmem:[#allocation3 + $0x740] ss:$16 sps:$4 sm:$0xff]  }
  0x4e   :  { %1665 = vmatmul.mubr.bf16.vlgmr.msra.gmra.mxu0 %v2771_v8 }
  0x4f   :  { %1708 = vmatmul.mubr.bf16.vlgmr.msra.gmra.mxu1 %v2773_v9  ;;  %1719 = vmatpush1.bf16.msra.mxu0 %v2417_v10  ;;  %v2503_v10 = vld [vmem:[#allocation3 + $0x524] ss:$16 sps:$4 sm:$0xff]  }
  0x50   :  { %1762 = vmatpush1.bf16.msra.mxu1 %v2420_v11  ;;  %1720 = vmatprep.subr.bf16.mxu0 %v2425_v12  ;;  %v2506_v11 = vld [vmem:[#allocation3 + $0x724] ss:$16 sps:$4 sm:$0xff]   ;;  %v2501_v12 = vld [vmem:[#allocation3 + $0x520] ss:$16 sps:$4 sm:$0xff]  }
  0x51   :  { %1763 = vmatprep.subr.bf16.mxu1 %v2428_v13  ;;  %1750 = vmatprep.mubr.bf16.mxu0 %v2799_v41  ;;  %v2504_v13 = vld [vmem:[#allocation3 + $0x720] ss:$16 sps:$4 sm:$0xff]  }
  0x52   :  { %1793 = vmatprep.mubr.bf16.mxu1 %v2803_v43 }
  0x53   :  { %1721 = vmatpush1.bf16.msra.mxu0 %v2423_v14  ;;  %v2509_v14 = vld [vmem:[#allocation3 + $0x504] ss:$16 sps:$4 sm:$0xff]  }
  0x54   :  { %1764 = vmatpush1.bf16.msra.mxu1 %v2426_v15  ;;  %1722 = vmatprep.subr.bf16.mxu0 %v2431_v16  ;;  %v2512_v15 = vld [vmem:[#allocation3 + $0x704] ss:$16 sps:$4 sm:$0xff]   ;;  %v2507_v16 = vld [vmem:[#allocation3 + $0x500] ss:$16 sps:$4 sm:$0xff]  }
  0x55   :  { %1765 = vmatprep.subr.bf16.mxu1 %v2434_v17  ;;  %v2510_v17 = vld [vmem:[#allocation3 + $0x700] ss:$16 sps:$4 sm:$0xff]  }
  0x57   :  { %1723 = vmatpush1.bf16.msra.mxu0 %v2429_v18  ;;  %v2515_v18 = vld [vmem:[#allocation3 + $0xec] ss:$16 sps:$4 sm:$0xff]  }
  0x58   :  { %1766 = vmatpush1.bf16.msra.mxu1 %v2432_v19  ;;  %1724 = vmatprep.subr.bf16.mxu0 %v2437_v20  ;;  %v2518_v19 = vld [vmem:[#allocation3 + $0x2ec] ss:$16 sps:$4 sm:$0xff]   ;;  %v2809_v20 = vcombine.low %v2780_v36, %v2785_v37 }
  0x59   :  { %1767 = vmatprep.subr.bf16.mxu1 %v2440_v21  ;;  %v2813_v21 = vcombine.low %v2790_v38, %v2795_v39  ;;  %v2539_v36 = vld [vmem:[#allocation3 + $0x6c] ss:$16 sps:$4 sm:$0xff]   ;;  %v2537_v38 = vld [vmem:[#allocation3 + $0x68] ss:$16 sps:$4 sm:$0xff]  }
  0x5a   :  { %v2542_v37 = vld [vmem:[#allocation3 + $0x26c] ss:$16 sps:$4 sm:$0xff]  }
  0x5b   :  { %1725 = vmatpush1.bf16.msra.mxu0 %v2435_v22  ;;  %v2513_v22 = vld [vmem:[#allocation3 + $0xe8] ss:$16 sps:$4 sm:$0xff]   ;;  %v2548_v39 = vld [vmem:[#allocation3 + $0x24c] ss:$16 sps:$4 sm:$0xff]  }
  0x5c   :  { %1768 = vmatpush1.bf16.msra.mxu1 %v2438_v23  ;;  %1726 = vmatprep.subr.bf16.mxu0 %v2443_v24  ;;  %v2516_v23 = vld [vmem:[#allocation3 + $0x2e8] ss:$16 sps:$4 sm:$0xff]   ;;  %v2521_v24 = vld [vmem:[#allocation3 + $0xcc] ss:$16 sps:$4 sm:$0xff]  }
  0x5d   :  { %1769 = vmatprep.subr.bf16.mxu1 %v2446_v25  ;;  %v2524_v25 = vld [vmem:[#allocation3 + $0x2cc] ss:$16 sps:$4 sm:$0xff]  }
  0x5f   :  { %1727 = vmatpush1.bf16.msra.mxu0 %v2441_v26  ;;  %v2519_v26 = vld [vmem:[#allocation3 + $0xc8] ss:$16 sps:$4 sm:$0xff]  }
  0x60   :  { %1770 = vmatpush1.bf16.msra.mxu1 %v2444_v27  ;;  %1728 = vmatprep.subr.bf16.mxu0 %v2449_v28  ;;  %v2522_v27 = vld [vmem:[#allocation3 + $0x2c8] ss:$16 sps:$4 sm:$0xff]   ;;  %v2527_v28 = vld [vmem:[#allocation3 + $0xac] ss:$16 sps:$4 sm:$0xff]  }
  0x61   :  { %1771 = vmatprep.subr.bf16.mxu1 %v2452_v29  ;;  %v2530_v29 = vld [vmem:[#allocation3 + $0x2ac] ss:$16 sps:$4 sm:$0xff]  }
  0x63   :  { %1729 = vmatpush1.bf16.msra.mxu0 %v2447_v30  ;;  %v2525_v30 = vld [vmem:[#allocation3 + $0xa8] ss:$16 sps:$4 sm:$0xff]  }
  0x64   :  { %1772 = vmatpush1.bf16.msra.mxu1 %v2450_v31  ;;  %1730 = vmatprep.subr.bf16.mxu0 %v2455_v32  ;;  %v2528_v31 = vld [vmem:[#allocation3 + $0x2a8] ss:$16 sps:$4 sm:$0xff]   ;;  %v2533_v32 = vld [vmem:[#allocation3 + $0x8c] ss:$16 sps:$4 sm:$0xff]  }
  0x65   :  { %1773 = vmatprep.subr.bf16.mxu1 %v2458_v33  ;;  %v2536_v33 = vld [vmem:[#allocation3 + $0x28c] ss:$16 sps:$4 sm:$0xff]  }
  0x67   :  { %1731 = vmatpush1.bf16.msra.mxu0 %v2453_v34  ;;  %v2531_v34 = vld [vmem:[#allocation3 + $0x88] ss:$16 sps:$4 sm:$0xff]  }
  0x68   :  { %1774 = vmatpush1.bf16.msra.mxu1 %v2456_v35  ;;  %1732 = vmatprep.subr.bf16.mxu0 %v2461_v40  ;;  %v2534_v35 = vld [vmem:[#allocation3 + $0x288] ss:$16 sps:$4 sm:$0xff]  }
  0x69   :  { %1775 = vmatprep.subr.bf16.mxu1 %v2464_v42  ;;  %v2543_v40 = vld [vmem:[#allocation3 + $0x48] ss:$16 sps:$4 sm:$0xff]  }
  0x6a   :  { %v2546_v42 = vld [vmem:[#allocation3 + $0x248] ss:$16 sps:$4 sm:$0xff]  }
  0x6b   :  { %1733 = vmatpush1.bf16.msra.mxu0 %v2459_v44  ;;  %v2551_v44 = vld [vmem:[#allocation3 + $0x2c] ss:$16 sps:$4 sm:$0xff]  }
  0x6c   :  { %1776 = vmatpush1.bf16.msra.mxu1 %v2462_v45  ;;  %1734 = vmatprep.subr.bf16.mxu0 %v2467_v46  ;;  %v2554_v45 = vld [vmem:[#allocation3 + $0x22c] ss:$16 sps:$4 sm:$0xff]   ;;  %v2549_v46 = vld [vmem:[#allocation3 + $0x28] ss:$16 sps:$4 sm:$0xff]  }
  0x6d   :  { %1777 = vmatprep.subr.bf16.mxu1 %v2470_v47  ;;  %v2552_v47 = vld [vmem:[#allocation3 + $0x228] ss:$16 sps:$4 sm:$0xff]  }
  0x6f   :  { %1735 = vmatpush2.bf16.msra.mxu0 %v2465_v48  ;;  %v2557_v48 = vld [vmem:[#allocation3 + $0xc] ss:$16 sps:$4 sm:$0xff]  }
  0x70   :  { %1778 = vmatpush2.bf16.msra.mxu1 %v2468_v49  ;;  %1736 = vmatprep.subr.bf16.mxu0 %v2473_v50  ;;  %v2560_v49 = vld [vmem:[#allocation3 + $0x20c] ss:$16 sps:$4 sm:$0xff]   ;;  %v2555_v50 = vld [vmem:[#allocation3 + $0x8] ss:$16 sps:$4 sm:$0xff]  }
  0x71   :  { %1779 = vmatprep.subr.bf16.mxu1 %v2476_v51  ;;  %v2558_v51 = vld [vmem:[#allocation3 + $0x208] ss:$16 sps:$4 sm:$0xff]  }
  0x73   :  { %1737 = vmatpush2.bf16.msra.mxu0 %v2471_v52  ;;  %v2563_v52 = vld [vmem:[#allocation3 + $0x1ec] ss:$16 sps:$4 sm:$0xff]  }
  0x74   :  { %1780 = vmatpush2.bf16.msra.mxu1 %v2474_v54  ;;  %1738 = vmatprep.subr.bf16.mxu0 %v2479_v56  ;;  %v2566_v54 = vld [vmem:[#allocation3 + $0x3ec] ss:$16 sps:$4 sm:$0xff]   ;;  %v2561_v56 = vld [vmem:[#allocation3 + $0x1e8] ss:$16 sps:$4 sm:$0xff]  }
  0x75   :  { %1781 = vmatprep.subr.bf16.mxu1 %v2482_v57  ;;  %v2564_v57 = vld [vmem:[#allocation3 + $0x3e8] ss:$16 sps:$4 sm:$0xff]  }
  0x77   :  { %1739 = vmatpush2.bf16.msra.mxu0 %v2477_v58  ;;  %v2569_v58 = vld [vmem:[#allocation3 + $0x1cc] ss:$16 sps:$4 sm:$0xff]  }
  0x78   :  { %1782 = vmatpush2.bf16.msra.mxu1 %v2480_v59  ;;  %1740 = vmatprep.subr.bf16.mxu0 %v2485_v60  ;;  %v2572_v59 = vld [vmem:[#allocation3 + $0x3cc] ss:$16 sps:$4 sm:$0xff]   ;;  %v2567_v60 = vld [vmem:[#allocation3 + $0x1c8] ss:$16 sps:$4 sm:$0xff]  }
  0x79   :  { %1783 = vmatprep.subr.bf16.mxu1 %v2488_v61  ;;  %v2570_v61 = vld [vmem:[#allocation3 + $0x3c8] ss:$16 sps:$4 sm:$0xff]  }
  0x7b   :  { %1741 = vmatpush2.bf16.msra.mxu0 %v2483_v62  ;;  %v2575_v62 = vld [vmem:[#allocation3 + $0x1ac] ss:$16 sps:$4 sm:$0xff]  }
  0x7c   :  { %1784 = vmatpush2.bf16.msra.mxu1 %v2486_v63  ;;  %1742 = vmatprep.subr.bf16.mxu0 %v2491_v0  ;;  %v2578_v63 = vld [vmem:[#allocation3 + $0x3ac] ss:$16 sps:$4 sm:$0xff]   ;;  %v2573_v0 = vld [vmem:[#allocation3 + $0x1a8] ss:$16 sps:$4 sm:$0xff]  }
  0x7d   :  { %1785 = vmatprep.subr.bf16.mxu1 %v2494_v1  ;;  %v2576_v1 = vld [vmem:[#allocation3 + $0x3a8] ss:$16 sps:$4 sm:$0xff]  }
  0x7f   :  { %1743 = vmatpush2.bf16.msra.mxu0 %v2489_v2  ;;  %v2581_v2 = vld [vmem:[#allocation3 + $0x18c] ss:$16 sps:$4 sm:$0xff]  }
  0x80   :  { %1786 = vmatpush2.bf16.msra.mxu1 %v2492_v3  ;;  %1744 = vmatprep.subr.bf16.mxu0 %v2497_v4  ;;  %v2584_v3 = vld [vmem:[#allocation3 + $0x38c] ss:$16 sps:$4 sm:$0xff]   ;;  %v2579_v4 = vld [vmem:[#allocation3 + $0x188] ss:$16 sps:$4 sm:$0xff]  }
  0x81   :  { %1787 = vmatprep.subr.bf16.mxu1 %v2500_v5  ;;  %v2582_v5 = vld [vmem:[#allocation3 + $0x388] ss:$16 sps:$4 sm:$0xff]  }
  0x83   :  { %1745 = vmatpush2.bf16.msra.mxu0 %v2495_v6  ;;  %v2587_v6 = vld [vmem:[#allocation3 + $0x16c] ss:$16 sps:$4 sm:$0xff]  }
  0x84   :  { %1788 = vmatpush2.bf16.msra.mxu1 %v2498_v7  ;;  %1746 = vmatprep.subr.bf16.mxu0 %v2503_v10  ;;  %v2590_v7 = vld [vmem:[#allocation3 + $0x36c] ss:$16 sps:$4 sm:$0xff]   ;;  %v2585_v10 = vld [vmem:[#allocation3 + $0x168] ss:$16 sps:$4 sm:$0xff]  }
  0x85   :  { %1789 = vmatprep.subr.bf16.mxu1 %v2506_v11  ;;  %v2588_v11 = vld [vmem:[#allocation3 + $0x368] ss:$16 sps:$4 sm:$0xff]  }
  0x87   :  { %1747 = vmatpush2.bf16.msra.mxu0 %v2501_v12  ;;  %v2593_v12 = vld [vmem:[#allocation3 + $0x14c] ss:$16 sps:$4 sm:$0xff]  }
  0x88   :  { %1790 = vmatpush2.bf16.msra.mxu1 %v2504_v13  ;;  %1748 = vmatprep.subr.bf16.mxu0 %v2509_v14  ;;  %v2596_v13 = vld [vmem:[#allocation3 + $0x34c] ss:$16 sps:$4 sm:$0xff]   ;;  %v2591_v14 = vld [vmem:[#allocation3 + $0x148] ss:$16 sps:$4 sm:$0xff]  }
  0x89   :  { %1791 = vmatprep.subr.bf16.mxu1 %v2512_v15  ;;  %v2594_v15 = vld [vmem:[#allocation3 + $0x348] ss:$16 sps:$4 sm:$0xff]  }
  0x8b   :  { %1749 = vmatpush2.bf16.msra.mxu0 %v2507_v16  ;;  %v2599_v16 = vld [vmem:[#allocation3 + $0x12c] ss:$16 sps:$4 sm:$0xff]  }
  0x8c   :  { %1792 = vmatpush2.bf16.msra.mxu1 %v2510_v17  ;;  %1804 = vmatprep.subr.bf16.mxu0 %v2515_v18  ;;  %v2602_v17 = vld [vmem:[#allocation3 + $0x32c] ss:$16 sps:$4 sm:$0xff]   ;;  %v2597_v18 = vld [vmem:[#allocation3 + $0x128] ss:$16 sps:$4 sm:$0xff]  }
  0x8d   :  { %1847 = vmatprep.subr.bf16.mxu1 %v2518_v19  ;;  %v2600_v19 = vld [vmem:[#allocation3 + $0x328] ss:$16 sps:$4 sm:$0xff]  }
  0x8e   :  { %1751 = vmatmul.mubr.bf16.vlgmr.msra.gmra.mxu0 %v2809_v20 }
  0x8f   :  { %1794 = vmatmul.mubr.bf16.vlgmr.msra.gmra.mxu1 %v2813_v21  ;;  %1805 = vmatpush1.bf16.msra.mxu0 %v2513_v22  ;;  %v2605_v22 = vld [vmem:[#allocation3 + $0x10c] ss:$16 sps:$4 sm:$0xff]  }
  0x90   :  { %1848 = vmatpush1.bf16.msra.mxu1 %v2516_v23  ;;  %1806 = vmatprep.subr.bf16.mxu0 %v2521_v24  ;;  %v2608_v23 = vld [vmem:[#allocation3 + $0x30c] ss:$16 sps:$4 sm:$0xff]   ;;  %v2603_v24 = vld [vmem:[#allocation3 + $0x108] ss:$16 sps:$4 sm:$0xff]  }
  0x91   :  { %1849 = vmatprep.subr.bf16.mxu1 %v2524_v25  ;;  %1836 = vmatprep.mubr.bf16.mxu0 %v2765_v53  ;;  %v2540_v53 = vld [vmem:[#allocation3 + $0x268] ss:$16 sps:$4 sm:$0xff]  }
  0x92   :  { %1879 = vmatprep.mubr.bf16.mxu1 %v2767_v55  ;;  %v2545_v55 = vld [vmem:[#allocation3 + $0x4c] ss:$16 sps:$4 sm:$0xff]   ;;  %v2606_v25 = vld [vmem:[#allocation3 + $0x308] ss:$16 sps:$4 sm:$0xff]  }
  0x93   :  { %1807 = vmatpush1.bf16.msra.mxu0 %v2519_v26  ;;  %v2611_v26 = vld [vmem:[#allocation3 + $0x4ec] ss:$16 sps:$4 sm:$0xff]  }
  0x94   :  { %1850 = vmatpush1.bf16.msra.mxu1 %v2522_v27  ;;  %1808 = vmatprep.subr.bf16.mxu0 %v2527_v28  ;;  %v2614_v27 = vld [vmem:[#allocation3 + $0x6ec] ss:$16 sps:$4 sm:$0xff]   ;;  %v2609_v28 = vld [vmem:[#allocation3 + $0x4e8] ss:$16 sps:$4 sm:$0xff]  }
  0x95   :  { %1851 = vmatprep.subr.bf16.mxu1 %v2530_v29  ;;  %v2612_v29 = vld [vmem:[#allocation3 + $0x6e8] ss:$16 sps:$4 sm:$0xff]  }
  0x97   :  { %1809 = vmatpush1.bf16.msra.mxu0 %v2525_v30  ;;  %v2617_v30 = vld [vmem:[#allocation3 + $0x4cc] ss:$16 sps:$4 sm:$0xff]  }
  0x98   :  { %1852 = vmatpush1.bf16.msra.mxu1 %v2528_v31  ;;  %1810 = vmatprep.subr.bf16.mxu0 %v2533_v32  ;;  %v2620_v31 = vld [vmem:[#allocation3 + $0x6cc] ss:$16 sps:$4 sm:$0xff]   ;;  %v2615_v32 = vld [vmem:[#allocation3 + $0x4c8] ss:$16 sps:$4 sm:$0xff]  }
  0x99   :  { %1853 = vmatprep.subr.bf16.mxu1 %v2536_v33  ;;  %v2618_v33 = vld [vmem:[#allocation3 + $0x6c8] ss:$16 sps:$4 sm:$0xff]  }
  0x9b   :  { %1811 = vmatpush1.bf16.msra.mxu0 %v2531_v34  ;;  %v2623_v34 = vld [vmem:[#allocation3 + $0x4ac] ss:$16 sps:$4 sm:$0xff]  }
  0x9c   :  { %1854 = vmatpush1.bf16.msra.mxu1 %v2534_v35  ;;  %1812 = vmatprep.subr.bf16.mxu0 %v2539_v36  ;;  %v2626_v35 = vld [vmem:[#allocation3 + $0x6ac] ss:$16 sps:$4 sm:$0xff]   ;;  %v2621_v36 = vld [vmem:[#allocation3 + $0x4a8] ss:$16 sps:$4 sm:$0xff]  }
  0x9d   :  { %1855 = vmatprep.subr.bf16.mxu1 %v2542_v37  ;;  %v2624_v37 = vld [vmem:[#allocation3 + $0x6a8] ss:$16 sps:$4 sm:$0xff]  }
  0x9f   :  { %1813 = vmatpush1.bf16.msra.mxu0 %v2537_v38  ;;  %v2627_v38 = vld [vmem:[#allocation3 + $0x488] ss:$16 sps:$4 sm:$0xff]  }
  0xa0   :  { %1856 = vmatpush1.bf16.msra.mxu1 %v2540_v53  ;;  %1814 = vmatprep.subr.bf16.mxu0 %v2545_v55  ;;  %v2630_v53 = vld [vmem:[#allocation3 + $0x688] ss:$16 sps:$4 sm:$0xff]   ;;  %v2635_v55 = vld [vmem:[#allocation3 + $0x46c] ss:$16 sps:$4 sm:$0xff]  }
  0xa1   :  { %1857 = vmatprep.subr.bf16.mxu1 %v2548_v39  ;;  %v2638_v39 = vld [vmem:[#allocation3 + $0x66c] ss:$16 sps:$4 sm:$0xff]  }
  0xa3   :  { %1815 = vmatpush1.bf16.msra.mxu0 %v2543_v40  ;;  %v2641_v40 = vld [vmem:[#allocation3 + $0x44c] ss:$16 sps:$4 sm:$0xff]  }
  0xa4   :  { %1858 = vmatpush1.bf16.msra.mxu1 %v2546_v42  ;;  %1816 = vmatprep.subr.bf16.mxu0 %v2551_v44  ;;  %v2644_v42 = vld [vmem:[#allocation3 + $0x64c] ss:$16 sps:$4 sm:$0xff]   ;;  %v2639_v44 = vld [vmem:[#allocation3 + $0x448] ss:$16 sps:$4 sm:$0xff]  }
  0xa5   :  { %1859 = vmatprep.subr.bf16.mxu1 %v2554_v45  ;;  %v2642_v45 = vld [vmem:[#allocation3 + $0x648] ss:$16 sps:$4 sm:$0xff]  }
  0xa7   :  { %1817 = vmatpush1.bf16.msra.mxu0 %v2549_v46  ;;  %v2647_v46 = vld [vmem:[#allocation3 + $0x42c] ss:$16 sps:$4 sm:$0xff]  }
  0xa8   :  { %1860 = vmatpush1.bf16.msra.mxu1 %v2552_v47  ;;  %1818 = vmatprep.subr.bf16.mxu0 %v2557_v48  ;;  %v2650_v47 = vld [vmem:[#allocation3 + $0x62c] ss:$16 sps:$4 sm:$0xff]   ;;  %v2645_v48 = vld [vmem:[#allocation3 + $0x428] ss:$16 sps:$4 sm:$0xff]  }
  0xa9   :  { %1861 = vmatprep.subr.bf16.mxu1 %v2560_v49  ;;  %v2648_v49 = vld [vmem:[#allocation3 + $0x628] ss:$16 sps:$4 sm:$0xff]  }
  0xab   :  { %1819 = vmatpush1.bf16.msra.mxu0 %v2555_v50  ;;  %v2653_v50 = vld [vmem:[#allocation3 + $0x40c] ss:$16 sps:$4 sm:$0xff]  }
  0xac   :  { %1862 = vmatpush1.bf16.msra.mxu1 %v2558_v51  ;;  %1820 = vmatprep.subr.bf16.mxu0 %v2563_v52  ;;  %v2656_v51 = vld [vmem:[#allocation3 + $0x60c] ss:$16 sps:$4 sm:$0xff]   ;;  %v2651_v52 = vld [vmem:[#allocation3 + $0x408] ss:$16 sps:$4 sm:$0xff]  }
  0xad   :  { %1863 = vmatprep.subr.bf16.mxu1 %v2566_v54  ;;  %v2654_v54 = vld [vmem:[#allocation3 + $0x608] ss:$16 sps:$4 sm:$0xff]  }
  0xaf   :  { %1821 = vmatpush2.bf16.msra.mxu0 %v2561_v56  ;;  %v2659_v56 = vld [vmem:[#allocation3 + $0x5ec] ss:$16 sps:$4 sm:$0xff]  }
  0xb0   :  { %1864 = vmatpush2.bf16.msra.mxu1 %v2564_v57  ;;  %1822 = vmatprep.subr.bf16.mxu0 %v2569_v58  ;;  %v2662_v57 = vld [vmem:[#allocation3 + $0x7ec] ss:$16 sps:$4 sm:$0xff]   ;;  %v2657_v58 = vld [vmem:[#allocation3 + $0x5e8] ss:$16 sps:$4 sm:$0xff]  }
  0xb1   :  { %1865 = vmatprep.subr.bf16.mxu1 %v2572_v59  ;;  %v2660_v59 = vld [vmem:[#allocation3 + $0x7e8] ss:$16 sps:$4 sm:$0xff]  }
  0xb3   :  { %1823 = vmatpush2.bf16.msra.mxu0 %v2567_v60  ;;  %v2665_v60 = vld [vmem:[#allocation3 + $0x5cc] ss:$16 sps:$4 sm:$0xff]  }
  0xb4   :  { %1866 = vmatpush2.bf16.msra.mxu1 %v2570_v61  ;;  %1824 = vmatprep.subr.bf16.mxu0 %v2575_v62  ;;  %v2668_v61 = vld [vmem:[#allocation3 + $0x7cc] ss:$16 sps:$4 sm:$0xff]   ;;  %v2663_v62 = vld [vmem:[#allocation3 + $0x5c8] ss:$16 sps:$4 sm:$0xff]  }
  0xb5   :  { %1867 = vmatprep.subr.bf16.mxu1 %v2578_v63  ;;  %v2666_v63 = vld [vmem:[#allocation3 + $0x7c8] ss:$16 sps:$4 sm:$0xff]  }
  0xb7   :  { %1825 = vmatpush2.bf16.msra.mxu0 %v2573_v0  ;;  %v2671_v0 = vld [vmem:[#allocation3 + $0x5ac] ss:$16 sps:$4 sm:$0xff]  }
  0xb8   :  { %1868 = vmatpush2.bf16.msra.mxu1 %v2576_v1  ;;  %1826 = vmatprep.subr.bf16.mxu0 %v2581_v2  ;;  %v2674_v1 = vld [vmem:[#allocation3 + $0x7ac] ss:$16 sps:$4 sm:$0xff]   ;;  %v2669_v2 = vld [vmem:[#allocation3 + $0x5a8] ss:$16 sps:$4 sm:$0xff]  }
  0xb9   :  { %1869 = vmatprep.subr.bf16.mxu1 %v2584_v3  ;;  %v2672_v3 = vld [vmem:[#allocation3 + $0x7a8] ss:$16 sps:$4 sm:$0xff]  }
  0xbb   :  { %1827 = vmatpush2.bf16.msra.mxu0 %v2579_v4  ;;  %v2677_v4 = vld [vmem:[#allocation3 + $0x58c] ss:$16 sps:$4 sm:$0xff]  }
  0xbc   :  { %1870 = vmatpush2.bf16.msra.mxu1 %v2582_v5  ;;  %1828 = vmatprep.subr.bf16.mxu0 %v2587_v6  ;;  %v2680_v5 = vld [vmem:[#allocation3 + $0x78c] ss:$16 sps:$4 sm:$0xff]   ;;  %v2675_v6 = vld [vmem:[#allocation3 + $0x588] ss:$16 sps:$4 sm:$0xff]  }
  0xbd   :  { %1871 = vmatprep.subr.bf16.mxu1 %v2590_v7  ;;  %v2678_v7 = vld [vmem:[#allocation3 + $0x788] ss:$16 sps:$4 sm:$0xff]  }
  0xbf   :  { %1829 = vmatpush2.bf16.msra.mxu0 %v2585_v10  ;;  %v2683_v10 = vld [vmem:[#allocation3 + $0x56c] ss:$16 sps:$4 sm:$0xff]  }
  0xc0   :  { %1872 = vmatpush2.bf16.msra.mxu1 %v2588_v11  ;;  %1830 = vmatprep.subr.bf16.mxu0 %v2593_v12  ;;  %v2686_v11 = vld [vmem:[#allocation3 + $0x76c] ss:$16 sps:$4 sm:$0xff]   ;;  %v2681_v12 = vld [vmem:[#allocation3 + $0x568] ss:$16 sps:$4 sm:$0xff]  }
  0xc1   :  { %1873 = vmatprep.subr.bf16.mxu1 %v2596_v13  ;;  %v2684_v13 = vld [vmem:[#allocation3 + $0x768] ss:$16 sps:$4 sm:$0xff]  }
  0xc3   :  { %1831 = vmatpush2.bf16.msra.mxu0 %v2591_v14  ;;  %v2689_v14 = vld [vmem:[#allocation3 + $0x54c] ss:$16 sps:$4 sm:$0xff]  }
  0xc4   :  { %1874 = vmatpush2.bf16.msra.mxu1 %v2594_v15  ;;  %1832 = vmatprep.subr.bf16.mxu0 %v2599_v16  ;;  %v2692_v15 = vld [vmem:[#allocation3 + $0x74c] ss:$16 sps:$4 sm:$0xff]   ;;  %v2687_v16 = vld [vmem:[#allocation3 + $0x548] ss:$16 sps:$4 sm:$0xff]  }
  0xc5   :  { %1875 = vmatprep.subr.bf16.mxu1 %v2602_v17  ;;  %v2690_v17 = vld [vmem:[#allocation3 + $0x748] ss:$16 sps:$4 sm:$0xff]  }
  0xc7   :  { %1833 = vmatpush2.bf16.msra.mxu0 %v2597_v18  ;;  %v2695_v18 = vld [vmem:[#allocation3 + $0x52c] ss:$16 sps:$4 sm:$0xff]  }
  0xc8   :  { %1876 = vmatpush2.bf16.msra.mxu1 %v2600_v19  ;;  %1834 = vmatprep.subr.bf16.mxu0 %v2605_v22  ;;  %v2698_v19 = vld [vmem:[#allocation3 + $0x72c] ss:$16 sps:$4 sm:$0xff]   ;;  %v2693_v22 = vld [vmem:[#allocation3 + $0x528] ss:$16 sps:$4 sm:$0xff]  }
  0xc9   :  { %1877 = vmatprep.subr.bf16.mxu1 %v2608_v23  ;;  %v2696_v23 = vld [vmem:[#allocation3 + $0x728] ss:$16 sps:$4 sm:$0xff]  }
  0xcb   :  { %1835 = vmatpush2.bf16.msra.mxu0 %v2603_v24  ;;  %v2701_v24 = vld [vmem:[#allocation3 + $0x50c] ss:$16 sps:$4 sm:$0xff]  }
  0xcc   :  { %1878 = vmatpush2.bf16.msra.mxu1 %v2606_v25  ;;  %1890 = vmatprep.subr.bf16.mxu0 %v2611_v26  ;;  %v2704_v25 = vld [vmem:[#allocation3 + $0x70c] ss:$16 sps:$4 sm:$0xff]   ;;  %v2699_v26 = vld [vmem:[#allocation3 + $0x508] ss:$16 sps:$4 sm:$0xff]  }
  0xcd   :  { %1933 = vmatprep.subr.bf16.mxu1 %v2614_v27  ;;  %v2702_v27 = vld [vmem:[#allocation3 + $0x708] ss:$16 sps:$4 sm:$0xff]  }
  0xce   :  { %1837 = vmatmul.mubr.bf16.vlgmr.msra.gmra.mxu0 %v2771_v8  ;;  %v2629_v8 = vld [vmem:[#allocation3 + $0x48c] ss:$16 sps:$4 sm:$0xff]  }
  0xcf   :  { %1880 = vmatmul.mubr.bf16.vlgmr.msra.gmra.mxu1 %v2773_v9  ;;  %1891 = vmatpush1.bf16.msra.mxu0 %v2609_v28  ;;  %v2632_v9 = vld [vmem:[#allocation3 + $0x68c] ss:$16 sps:$4 sm:$0xff]  }
  0xd0   :  { %1934 = vmatpush1.bf16.msra.mxu1 %v2612_v29  ;;  %1892 = vmatprep.subr.bf16.mxu0 %v2617_v30  ;;  %v2005_v30 = vlaneseq }
  0xd1   :  { %1935 = vmatprep.subr.bf16.mxu1 %v2620_v31  ;;  %1922 = vmatprep.mubr.bf16.mxu0 %v2799_v41  ;;  %v2633_v41 = vld [vmem:[#allocation3 + $0x468] ss:$16 sps:$4 sm:$0xff]  }
  0xd2   :  { %1965 = vmatprep.mubr.bf16.mxu1 %v2803_v43  ;;  %v2636_v43 = vld [vmem:[#allocation3 + $0x668] ss:$16 sps:$4 sm:$0xff]  }
  0xd3   :  { %1893 = vmatpush1.bf16.msra.mxu0 %v2615_v32 }
  0xd4   :  { %1936 = vmatpush1.bf16.msra.mxu1 %v2618_v33  ;;  %1894 = vmatprep.subr.bf16.mxu0 %v2623_v34  ;;  %v2825_v33 = vshrl.u32 %v2005_v30, 7 }
  0xd5   :  { %1937 = vmatprep.subr.bf16.mxu1 %v2626_v35 }
  0xd7   :  { %1895 = vmatpush1.bf16.msra.mxu0 %v2621_v36  ;;  %v2007_v36 = vsub.s32 0, %v2825_v33 }
  0xd8   :  { %1938 = vmatpush1.bf16.msra.mxu1 %v2624_v37  ;;  %1896 = vmatprep.subr.bf16.mxu0 %v2629_v8 }
  0xd9   :  { %1939 = vmatprep.subr.bf16.mxu1 %v2632_v9  ;;  %v2003_v9 = vld [vmem:[%s2860_s2] sm:$0xf] }
  0xdb   :  { %1897 = vmatpush1.bf16.msra.mxu0 %v2627_v38 }
  0xdc   :  { %1940 = vmatpush1.bf16.msra.mxu1 %v2630_v53  ;;  %1898 = vmatprep.subr.bf16.mxu0 %v2635_v55 }
  0xdd   :  { %1941 = vmatprep.subr.bf16.mxu1 %v2638_v39 }
  0xdf   :  { %1899 = vmatpush1.bf16.msra.mxu0 %v2633_v41  ;;  %v2008_v41 = vrot.slane %v2003_v9, %v2007_v36 }
  0xe0   :  { %1942 = vmatpush1.bf16.msra.mxu1 %v2636_v43  ;;  %1900 = vmatprep.subr.bf16.mxu0 %v2641_v40 }
  0xe1   :  { %1943 = vmatprep.subr.bf16.mxu1 %v2644_v42 }
  0xe3   :  { %1901 = vmatpush1.bf16.msra.mxu0 %v2639_v44 }
  0xe4   :  { %1944 = vmatpush1.bf16.msra.mxu1 %v2642_v45  ;;  %1902 = vmatprep.subr.bf16.mxu0 %v2647_v46 }
  0xe5   :  { %1945 = vmatprep.subr.bf16.mxu1 %v2650_v47 }
  0xe7   :  { %1903 = vmatpush1.bf16.msra.mxu0 %v2645_v48 }
  0xe8   :  { %1946 = vmatpush1.bf16.msra.mxu1 %v2648_v49  ;;  %1904 = vmatprep.subr.bf16.mxu0 %v2653_v50 }
  0xe9   :  { %1947 = vmatprep.subr.bf16.mxu1 %v2656_v51 }
  0xeb   :  { %1905 = vmatpush1.bf16.msra.mxu0 %v2651_v52 }
  0xec   :  { %1948 = vmatpush1.bf16.msra.mxu1 %v2654_v54  ;;  %1906 = vmatprep.subr.bf16.mxu0 %v2659_v56 }
  0xed   :  { %1949 = vmatprep.subr.bf16.mxu1 %v2662_v57 }
  0xef   :  { %1907 = vmatpush2.bf16.msra.mxu0 %v2657_v58 }
  0xf0   :  { %1950 = vmatpush2.bf16.msra.mxu1 %v2660_v59  ;;  %1908 = vmatprep.subr.bf16.mxu0 %v2665_v60 }
  0xf1   :  { %1951 = vmatprep.subr.bf16.mxu1 %v2668_v61 }
  0xf3   :  { %1909 = vmatpush2.bf16.msra.mxu0 %v2663_v62 }
  0xf4   :  { %1952 = vmatpush2.bf16.msra.mxu1 %v2666_v63  ;;  %1910 = vmatprep.subr.bf16.mxu0 %v2671_v0 }
  0xf5   :  { %1953 = vmatprep.subr.bf16.mxu1 %v2674_v1 }
  0xf7   :  { %1911 = vmatpush2.bf16.msra.mxu0 %v2669_v2 }
  0xf8   :  { %1954 = vmatpush2.bf16.msra.mxu1 %v2672_v3  ;;  %1912 = vmatprep.subr.bf16.mxu0 %v2677_v4 }
  0xf9   :  { %1955 = vmatprep.subr.bf16.mxu1 %v2680_v5 }
  0xfb   :  { %1913 = vmatpush2.bf16.msra.mxu0 %v2675_v6 }
  0xfc   :  { %1956 = vmatpush2.bf16.msra.mxu1 %v2678_v7  ;;  %1914 = vmatprep.subr.bf16.mxu0 %v2683_v10 }
  0xfd   :  { %1957 = vmatprep.subr.bf16.mxu1 %v2686_v11  ;;  %v2015_v11 = vsub.s32 2, %v2825_v33 }
  0xff   :  { %1915 = vmatpush2.bf16.msra.mxu0 %v2681_v12 }
 0x100   :  { %1958 = vmatpush2.bf16.msra.mxu1 %v2684_v13  ;;  %1916 = vmatprep.subr.bf16.mxu0 %v2689_v14 }
 0x101   :  { %1959 = vmatprep.subr.bf16.mxu1 %v2692_v15  ;;  %v2019_v15 = vsub.s32 3, %v2825_v33 }
 0x103   :  { %1917 = vmatpush2.bf16.msra.mxu0 %v2687_v16 }
 0x104   :  { %1960 = vmatpush2.bf16.msra.mxu1 %v2690_v17  ;;  %1918 = vmatprep.subr.bf16.mxu0 %v2695_v18 }
 0x105   :  { %1961 = vmatprep.subr.bf16.mxu1 %v2698_v19 }
 0x107   :  { %1919 = vmatpush2.bf16.msra.mxu0 %v2693_v22  ;;  %v2016_v22 = vrot.slane %v2003_v9, %v2015_v11 }
 0x108   :  { %1962 = vmatpush2.bf16.msra.mxu1 %v2696_v23  ;;  %1920 = vmatprep.subr.bf16.mxu0 %v2701_v24 }
 0x109   :  { %1963 = vmatprep.subr.bf16.mxu1 %v2704_v25 }
 0x10b   :  { %1921 = vmatpush2.bf16.msra.mxu0 %v2699_v26 }
 0x10c   :  { %1964 = vmatpush2.bf16.msra.mxu1 %v2702_v27 }
 0x10e   :  { %1923 = vmatmul.mubr.bf16.vlgmr.msra.gmra.mxu0 %v2809_v20  ;;  %v1666_v28 = vpop.f32.mrf.mxu0 }
 0x10f   :  { %1966 = vmatmul.mubr.bf16.vlgmr.msra.gmra.mxu1 %v2813_v21  ;;  %v1709_v29 = vpop.f32.mrf.mxu1  ;;  %v2011_v21 = vsub.s32 1, %v2825_v33 }
 0x110   :  { %v1668_v31 = vpop.f32.mrf.mxu0  ;;  %v1710_v20 = vadd.f32 %v1709_v29, %v1666_v28  ;;  %v2020_v28 = vrot.slane %v2003_v9, %v2019_v15 }
 0x111   :  { %v1711_v32 = vpop.f32.mrf.mxu1  ;;  %v2012_v46 = vrot.slane %v2003_v9, %v2011_v21 }
 0x112   :  { %v1670_v34 = vpop.f32.mrf.mxu0  ;;  %v1712_v55 = vadd.f32 %v1711_v32, %v1668_v31 }
 0x113   :  { %v1713_v35 = vpop.f32.mrf.mxu1 }
 0x114   :  { %v1672_v37 = vpop.f32.mrf.mxu0  ;;  %v1714_v42 = vadd.f32 %v1713_v35, %v1670_v34 }
 0x115   :  { %v1715_v8 = vpop.f32.mrf.mxu1 }
 0x116   :  { %v1716_v49 = vadd.f32 %v1715_v8, %v1672_v37 }
 0x14e   :  { %v1752_v38 = vpop.f32.mrf.mxu0 }
 0x14f   :  { %v1795_v53 = vpop.f32.mrf.mxu1  ;;  %v1753_v39 = vadd.f32 %v1752_v38, %v1710_v20 }
 0x150   :  { %v1754_v43 = vpop.f32.mrf.mxu0 }
 0x151   :  { %v1797_v40 = vpop.f32.mrf.mxu1  ;;  %v1796_v44 = vadd.f32 %v1795_v53, %v1753_v39  ;;  %v1755_v45 = vadd.f32 %v1754_v43, %v1712_v55 }
 0x152   :  { %v1756_v47 = vpop.f32.mrf.mxu0 }
 0x153   :  { %v1799_v48 = vpop.f32.mrf.mxu1  ;;  %v2025_v50 = vadd.f32 %v2008_v41, %v1796_v44  ;;  %v1798_v51 = vadd.f32 %v1797_v40, %v1755_v45  ;;  %v1757_v52 = vadd.f32 %v1756_v47, %v1714_v42 }
 0x154   :  { %v1758_v54 = vpop.f32.mrf.mxu0 }
 0x155   :  { %v2033_v56 = vmax.f32 %v2025_v50, 0.0  ;;  %v2026_v57 = vadd.f32 %v2012_v46, %v1798_v51  ;;  %v1800_v58 = vadd.f32 %v1799_v48, %v1757_v52  ;;  %v1759_v59 = vadd.f32 %v1758_v54, %v1716_v49  ;;  %v1801_v60 = vpop.f32.mrf.mxu1 }
 0x157   :  { %2041 = vst [vmem:[%s2861_s3] sm:$0xff] %v2033_v56  ;;  %v2034_v61 = vmax.f32 %v2026_v57, 0.0  ;;  %v2029_v62 = vadd.f32 %v2008_v41, %v1800_v58  ;;  %v1802_v63 = vadd.f32 %v1801_v60, %v1759_v59 }
 0x159   :  { %2042 = vst [vmem:[%s2861_s3 + $0x8] sm:$0xff] %v2034_v61  ;;  %v2037_v0 = vmax.f32 %v2029_v62, 0.0  ;;  %v2030_v1 = vadd.f32 %v2012_v46, %v1802_v63 }
 0x15b   :  { %2045 = vst [vmem:[%s2861_s3 + $0x20] sm:$0xff] %v2037_v0  ;;  %v2038_v2 = vmax.f32 %v2030_v1, 0.0 }
 0x15d   :  { %2046 = vst [vmem:[%s2861_s3 + $0x28] sm:$0xff] %v2038_v2 }
 0x18e   :  { %v1838_v3 = vpop.f32.mrf.mxu0 }
 0x18f   :  { %v1881_v4 = vpop.f32.mrf.mxu1 }
 0x190   :  { %v1840_v5 = vpop.f32.mrf.mxu0  ;;  %v1882_v14 = vadd.f32 %v1881_v4, %v1838_v3 }
 0x191   :  { %v1883_v6 = vpop.f32.mrf.mxu1 }
 0x192   :  { %v1842_v7 = vpop.f32.mrf.mxu0  ;;  %v1884_v18 = vadd.f32 %v1883_v6, %v1840_v5 }
 0x193   :  { %v1885_v10 = vpop.f32.mrf.mxu1 }
 0x194   :  { %v1844_v12 = vpop.f32.mrf.mxu0  ;;  %v1886_v25 = vadd.f32 %v1885_v10, %v1842_v7 }
 0x195   :  { %v1887_v13 = vpop.f32.mrf.mxu1 }
 0x196   :  { %v1888_v31 = vadd.f32 %v1887_v13, %v1844_v12 }
 0x1ce   :  { %v1924_v16 = vpop.f32.mrf.mxu0 }
 0x1cf   :  { %v1967_v17 = vpop.f32.mrf.mxu1  ;;  %v1925_v19 = vadd.f32 %v1924_v16, %v1882_v14 }
 0x1d0   :  { %v1926_v23 = vpop.f32.mrf.mxu0 }
 0x1d1   :  { %v1969_v24 = vpop.f32.mrf.mxu1  ;;  %v1968_v26 = vadd.f32 %v1967_v17, %v1925_v19  ;;  %v1927_v27 = vadd.f32 %v1926_v23, %v1884_v18 }
 0x1d2   :  { %v1928_v29 = vpop.f32.mrf.mxu0 }
 0x1d3   :  { %v1971_v30 = vpop.f32.mrf.mxu1  ;;  %v2027_v32 = vadd.f32 %v2016_v22, %v1968_v26  ;;  %v1970_v34 = vadd.f32 %v1969_v24, %v1927_v27  ;;  %v1929_v35 = vadd.f32 %v1928_v29, %v1886_v25 }
 0x1d4   :  { %v1930_v36 = vpop.f32.mrf.mxu0 }
 0x1d5   :  { %v2035_v37 = vmax.f32 %v2027_v32, 0.0  ;;  %v2028_v33 = vadd.f32 %v2020_v28, %v1970_v34  ;;  %v1972_v8 = vadd.f32 %v1971_v30, %v1929_v35  ;;  %v1931_v20 = vadd.f32 %v1930_v36, %v1888_v31  ;;  %v1973_v21 = vpop.f32.mrf.mxu1 }
 0x1d7   :  { %2043 = vst [vmem:[%s2861_s3 + $0x10] sm:$0xff] %v2035_v37  ;;  %v2036_v38 = vmax.f32 %v2028_v33, 0.0  ;;  %v2031_v53 = vadd.f32 %v2016_v22, %v1972_v8  ;;  %v1974_v55 = vadd.f32 %v1973_v21, %v1931_v20 }
 0x1d9   :  { %2044 = vst [vmem:[%s2861_s3 + $0x18] sm:$0xff] %v2036_v38  ;;  %v2039_v9 = vmax.f32 %v2031_v53, 0.0  ;;  %v2032_v39 = vadd.f32 %v2020_v28, %v1974_v55 }
 0x1db   :  { %2047 = vst [vmem:[%s2861_s3 + $0x30] sm:$0xff] %v2039_v9  ;;  %v2040_v41 = vmax.f32 %v2032_v39, 0.0 }
 0x1dd   :  { %2048 = vst [vmem:[%s2861_s3 + $0x38] sm:$0xff] %v2040_v41 }
 0x1de   :  { %2053 = vsyncpa [#allocation4], 1 }

</bundles_post_ra>
